<compile_context>
chip_gen: v7x
topology: tpu7x:2x2x1
jax: 0.10.0
libtpu: 0.0.40
codegen_flags: <defaults>
</compile_context>

<pallas_src>
import jax
import jax.numpy as jnp
from jax.experimental import pallas as pl
from jax.experimental.pallas import tpu as pltpu


def _wavenet_kernel(x_ref, w_ref, shift_ref, o_ref, stack_ref):
    """One (Bb, C, L) batch-block per grid step.

    x_ref    : (Bb, C, L)   activations (also the residual)
    w_ref    : (C, 3*C)     conv weight with BN scale folded in:
                            cols [0:C]   = scale * W[:, :, 0]  (uses x[l-1])
                            cols [C:2C]  = scale * W[:, :, 1]  (uses x[l])
                            cols [2C:3C] = scale * W[:, :, 2]  (uses x[l+1])
    shift_ref: (C, 1)       beta - running_mean * scale
    o_ref    : (Bb, C, L)
    stack_ref: (3C, Bb*L)   VMEM scratch holding the shifted taps of all rows
    """
    Bb, C, L = x_ref.shape

    # Edge-column masks for the zero-padded conv (hoisted; shared by all rows).
    lane = jax.lax.broadcasted_iota(jnp.int32, (C, L), 1)
    first_col = lane == 0
    last_col = lane == (L - 1)

    # Stage the three taps of every batch row into one (3C, Bb*L) scratch.
    # Lane offsets b*L are multiples of 128 when L is -> aligned, unmasked vst.
    for b in range(Bb):
        xb = x_ref[b]  # (C, L)
        x_prev = jnp.where(first_col, 0.0, pltpu.roll(xb, 1, 1))      # x[l-1]
        x_next = jnp.where(last_col, 0.0, pltpu.roll(xb, L - 1, 1))   # x[l+1]
        stack_ref[0:C,           b * L:(b + 1) * L] = x_prev
        stack_ref[C:2 * C,       b * L:(b + 1) * L] = xb
        stack_ref[2 * C:3 * C,   b * L:(b + 1) * L] = x_next

    # ONE lane-wide MXU matmul per grid step: (C, 3C) @ (3C, Bb*L).
    y = jnp.dot(w_ref[...], stack_ref[...], preferred_element_type=jnp.float32)
    y = y + shift_ref[...]

    # Gated activation with a single transcendental and an EXACT divide:
    #   tanh(y) * sigmoid(y) == (1 - exp(-y)) / (1 + exp(-y)^2)
    # Clamp y below so exp(-y) stays finite; at y = -30 the true value is
    # already ~ -9e-14, so the clamp is numerically invisible.
    y = jnp.maximum(y, -30.0)
    t = jnp.exp(-y)
    gated = (1.0 - t) / (1.0 + t * t)          # (C, Bb*L), f32

    # Residual add + writeback, one aligned lane slice per batch row.
    for b in range(Bb):
        o_ref[b] = (gated[:, b * L:(b + 1) * L]
                    + x_ref[b].astype(jnp.float32)).astype(o_ref.dtype)


def _vmem_limit_bytes():
    """Generation-aware scoped-VMEM limit (≈64 MiB v5e/v6e, ≈48 MiB v7x)."""
    try:
        phys = int(pltpu.get_tpu_info().vmem_capacity_bytes)
    except Exception:  # noqa: BLE001 - conservative fallback valid everywhere
        return 32 * 1024 * 1024
    return int(min(max(phys - (16 << 20), 16 << 20), 64 << 20))


def _pick_batch_block(B, C, L, itemsize, vmem_limit_bytes):
    """Largest divisor of B that (a) keeps 2x(in)+2x(out)+3x(scratch) buffers
    well inside the scoped VMEM limit and (b) leaves >= 2 grid steps whenever
    B >= 2 (>= ~8 for large B) so both v7x TensorCores get work and the
    pipeline can overlap DMA with compute."""
    per_row = max(1, C * L * itemsize)            # one (C, L) batch row
    # x block budget ~ vmem_limit / 10  => ~7x that for all buffers + margin.
    cap_bytes = max(1, (vmem_limit_bytes // 10) // per_row)
    cap_steps = max(1, B // 8)                    # keep >= min(B, 8) grid steps
    cap = max(1, min(cap_bytes, cap_steps))
    bb = 1
    for d in range(1, min(B, cap) + 1):
        if B % d == 0:
            bb = d
    return bb


@jax.jit
def wavenet_layer_init(x, w, gamma, beta, running_mean, running_var, eps=1e-5):
    """x: (B, C, L); w: (C_out, C_in, 3) Conv1d weight (PyTorch layout).
    in_channels == out_channels (identity residual, as the module requires)."""
    B, C, L = x.shape
    assert w.shape == (C, C, 3), "identity residual requires in==out channels"

    # Fold BatchNorm1d (eval) into the conv weight + a per-channel shift.
    scale = gamma * jax.lax.rsqrt(running_var + eps)                    # (C,)
    w_folded = (jnp.concatenate([w[:, :, 0], w[:, :, 1], w[:, :, 2]], axis=1)
                * scale[:, None]).astype(jnp.float32)                   # (C, 3C)
    shift = (beta - running_mean * scale).reshape(C, 1).astype(jnp.float32)

    itemsize = x.dtype.itemsize
    vmem_limit = _vmem_limit_bytes()
    Bb = _pick_batch_block(B, C, L, itemsize, vmem_limit)
    assert B % Bb == 0

    per_row = C * L * itemsize
    approx_need = 7 * Bb * per_row + (C * 3 * C + C) * 4
    if approx_need > vmem_limit:
        # TODO(synk): add an L-tiling grid axis with a 1-element halo instead
        # of rejecting very long sequences.
        raise ValueError(
            f"block (Bb={Bb}, C={C}, L={L}) needs ~{approx_need} bytes of "
            f"VMEM, exceeding the {vmem_limit}-byte scoped limit; tile L.")

    grid_spec = pltpu.PrefetchScalarGridSpec(
        num_scalar_prefetch=0,
        grid=(B // Bb,),
        in_specs=[
            pl.BlockSpec((Bb, C, L), lambda i: (i, 0, 0)),
            pl.BlockSpec((C, 3 * C), lambda i: (0, 0)),
            pl.BlockSpec((C, 1), lambda i: (0, 0)),
        ],
        out_specs=pl.BlockSpec((Bb, C, L), lambda i: (i, 0, 0)),
        scratch_shapes=[pltpu.VMEM((3 * C, Bb * L), x.dtype)],
    )

    return pl.pallas_call(
        _wavenet_kernel,
        out_shape=jax.ShapeDtypeStruct((B, C, L), x.dtype),
        grid_spec=grid_spec,
        compiler_params=pltpu.CompilerParams(
            # Batch axis is embarrassingly parallel (shards across the two
            # v7x TensorCores; harmless on v5e/v6e).
            dimension_semantics=("parallel",),
            vmem_limit_bytes=vmem_limit,
        ),
    )(x, w_folded, shift)


def _reference(x, w, gamma, beta, running_mean, running_var, eps=1e-5):
    """Pure-JAX reference of the same forward pass (eval-mode semantics)."""
    B, C, L = x.shape
    x_pad = jnp.pad(x, ((0, 0), (0, 0), (1, 1)))
    y = jnp.zeros((B, C, L), jnp.float32)
    for k in range(3):
        y = y + jnp.einsum("oc,bcl->bol", w[:, :, k], x_pad[:, :, k:k + L])
    scale = gamma / jnp.sqrt(running_var + eps)
    y = y * scale[None, :, None] + (beta - running_mean * scale)[None, :, None]
    return jnp.tanh(y) * jax.nn.sigmoid(y) + x


if __name__ == "__main__":
    B, C, L = 2, 8, 128  # in_channels == out_channels == C (identity residual)

    key = jax.random.PRNGKey(0)
    k_x, k_w, k_g, k_b, k_m, k_v = jax.random.split(key, 6)

    x = jax.random.normal(k_x, (B, C, L), dtype=jnp.float32)
    w = jax.random.normal(k_w, (C, C, 3), dtype=jnp.float32) * 0.1  # Conv1d weight
    gamma = 1.0 + 0.1 * jax.random.normal(k_g, (C,), dtype=jnp.float32)
    beta = 0.1 * jax.random.normal(k_b, (C,), dtype=jnp.float32)
    running_mean = 0.1 * jax.random.normal(k_m, (C,), dtype=jnp.float32)
    running_var = 1.0 + 0.1 * jax.random.uniform(k_v, (C,), dtype=jnp.float32)

    out = wavenet_layer_init(x, w, gamma, beta, running_mean, running_var)
    out = jax.block_until_ready(out)

    ref = _reference(x, w, gamma, beta, running_mean, running_var)
    assert out.shape == (B, C, L)
    # Exact divide in the gated activation -> tight tolerance (only fp32
    # summation-order / single-exp-form differences remain).
    assert jnp.allclose(out, ref, atol=1e-4, rtol=1e-4), "mismatch vs reference"

    print("KERNEL_OK")
</pallas_src>

<mosaic_0001>
module attributes {stable_mosaic.version = 11 : i64} {
  func.func @_wavenet_kernel(%arg0: i32, %arg1: memref<1x8x128xf32, #tpu.memory_space<vmem>>, %arg2: memref<8x24xf32, #tpu.memory_space<vmem>>, %arg3: memref<8x1xf32, #tpu.memory_space<vmem>>, %arg4: memref<1x8x128xf32, #tpu.memory_space<vmem>>, %arg5: memref<24x128xf32, #tpu.memory_space<vmem>>) attributes {dimension_semantics = [#tpu.dimension_semantics<parallel>], iteration_bounds = array<i64: 2>, scalar_prefetch = 0 : i64, scratch_operands = 1 : i64, tpu.core_type = #tpu.core_type<tc>, window_params = [{transform_indices = @transform_0, window_bounds = array<i64: 1, 8, 128>}, {pipeline_mode = #tpu.pipeline_mode<synchronous>, transform_indices = @transform_1, window_bounds = array<i64: 8, 24>}, {pipeline_mode = #tpu.pipeline_mode<synchronous>, transform_indices = @transform_2, window_bounds = array<i64: 8, 1>}, {transform_indices = @transform_3, window_bounds = array<i64: 1, 8, 128>}]} {
    %0 = tpu.iota {dimensions = array<i32: 1>} : vector<8x128xi32>
    %c0_i32 = arith.constant 0 : i32
    %1 = vector.broadcast %c0_i32 : i32 to vector<8x128xi32>
    %2 = arith.cmpi eq, %0, %1 : vector<8x128xi32>
    %c127_i32 = arith.constant 127 : i32
    %3 = vector.broadcast %c127_i32 : i32 to vector<8x128xi32>
    %4 = arith.cmpi eq, %0, %3 : vector<8x128xi32>
    %c0 = arith.constant 0 : index
    %c0_0 = arith.constant 0 : index
    %c0_1 = arith.constant 0 : index
    %5 = vector.load %arg1[%c0, %c0_0, %c0_1] : memref<1x8x128xf32, #tpu.memory_space<vmem>>, vector<1x8x128xf32>
    %6 = vector.shape_cast %5 : vector<1x8x128xf32> to vector<8x128xf32>
    %c1_i32 = arith.constant 1 : i32
    %7 = tpu.dynamic_rotate %6 by %c1_i32 dim 1 : vector<8x128xf32>, i32 -> vector<8x128xf32>
    %cst = arith.constant 0.000000e+00 : f32
    %8 = vector.broadcast %cst : f32 to vector<8x128xf32>
    %9 = arith.select %2, %8, %7 : vector<8x128xi1>, vector<8x128xf32>
    %c127_i32_2 = arith.constant 127 : i32
    %10 = tpu.dynamic_rotate %6 by %c127_i32_2 dim 1 : vector<8x128xf32>, i32 -> vector<8x128xf32>
    %cst_3 = arith.constant 0.000000e+00 : f32
    %11 = vector.broadcast %cst_3 : f32 to vector<8x128xf32>
    %12 = arith.select %4, %11, %10 : vector<8x128xi1>, vector<8x128xf32>
    %c0_4 = arith.constant 0 : index
    %c0_5 = arith.constant 0 : index
    %13 = vector.load %arg5[%c0_4, %c0_5] : memref<24x128xf32, #tpu.memory_space<vmem>>, vector<8x128xf32>
    tpu.vector_store %arg5[%c0_4, %c0_5], %9 {strides = array<i32>} : memref<24x128xf32, #tpu.memory_space<vmem>>, vector<8x128xf32>,
    %c8 = arith.constant 8 : index
    %c0_6 = arith.constant 0 : index
    %14 = vector.load %arg5[%c8, %c0_6] : memref<24x128xf32, #tpu.memory_space<vmem>>, vector<8x128xf32>
    tpu.vector_store %arg5[%c8, %c0_6], %6 {strides = array<i32>} : memref<24x128xf32, #tpu.memory_space<vmem>>, vector<8x128xf32>,
    %c16 = arith.constant 16 : index
    %c0_7 = arith.constant 0 : index
    %15 = vector.load %arg5[%c16, %c0_7] : memref<24x128xf32, #tpu.memory_space<vmem>>, vector<8x128xf32>
    tpu.vector_store %arg5[%c16, %c0_7], %12 {strides = array<i32>} : memref<24x128xf32, #tpu.memory_space<vmem>>, vector<8x128xf32>,
    %c0_8 = arith.constant 0 : index
    %c0_9 = arith.constant 0 : index
    %16 = vector.load %arg2[%c0_8, %c0_9] : memref<8x24xf32, #tpu.memory_space<vmem>>, vector<8x24xf32>
    %c0_10 = arith.constant 0 : index
    %c0_11 = arith.constant 0 : index
    %17 = vector.load %arg5[%c0_10, %c0_11] : memref<24x128xf32, #tpu.memory_space<vmem>>, vector<24x128xf32>
    %cst_12 = arith.constant dense<0.000000e+00> : vector<8x128xf32>
    %18 = tpu.matmul %16, %17, %cst_12 {dimension_numbers = #tpu.dot_dimension_numbers<[1], [0], [0], [1], [0, 0, 1, 1], [], []>} : vector<8x24xf32>, vector<24x128xf32>, vector<8x128xf32> -> vector<8x128xf32>
    %c0_13 = arith.constant 0 : index
    %c0_14 = arith.constant 0 : index
    %19 = vector.load %arg3[%c0_13, %c0_14] : memref<8x1xf32, #tpu.memory_space<vmem>>, vector<8x1xf32>
    %20 = vector.broadcast %19 : vector<8x1xf32> to vector<8x128xf32>
    %21 = arith.addf %18, %20 : vector<8x128xf32>
    %cst_15 = arith.constant -3.000000e+01 : f32
    %22 = vector.broadcast %cst_15 : f32 to vector<8x128xf32>
    %23 = arith.maximumf %21, %22 : vector<8x128xf32>
    %cst_16 = arith.constant 0.000000e+00 : f32
    %24 = vector.broadcast %cst_16 : f32 to vector<8x128xf32>
    %25 = arith.subf %24, %23 : vector<8x128xf32>
    %26 = math.exp %25 : vector<8x128xf32>
    %cst_17 = arith.constant 1.000000e+00 : f32
    %27 = vector.broadcast %cst_17 : f32 to vector<8x128xf32>
    %28 = arith.subf %27, %26 : vector<8x128xf32>
    %29 = arith.mulf %26, %26 : vector<8x128xf32>
    %cst_18 = arith.constant 1.000000e+00 : f32
    %30 = vector.broadcast %cst_18 : f32 to vector<8x128xf32>
    %31 = arith.addf %30, %29 : vector<8x128xf32>
    %32 = arith.divf %28, %31 : vector<8x128xf32>
    %c0_19 = arith.constant 0 : index
    %c0_20 = arith.constant 0 : index
    %c0_21 = arith.constant 0 : index
    %33 = vector.load %arg1[%c0_19, %c0_20, %c0_21] : memref<1x8x128xf32, #tpu.memory_space<vmem>>, vector<1x8x128xf32>
    %34 = vector.shape_cast %33 : vector<1x8x128xf32> to vector<8x128xf32>
    %35 = arith.addf %32, %34 : vector<8x128xf32>
    %c0_22 = arith.constant 0 : index
    %c0_23 = arith.constant 0 : index
    %c0_24 = arith.constant 0 : index
    %36 = vector.load %arg4[%c0_22, %c0_23, %c0_24] : memref<1x8x128xf32, #tpu.memory_space<vmem>>, vector<1x8x128xf32>
    %37 = vector.shape_cast %36 : vector<1x8x128xf32> to vector<8x128xf32>
    %38 = vector.shape_cast %35 : vector<8x128xf32> to vector<1x8x128xf32>
    tpu.vector_store %arg4[%c0_22, %c0_23, %c0_24], %38 {strides = array<i32>} : memref<1x8x128xf32, #tpu.memory_space<vmem>>, vector<1x8x128xf32>,
    return
  }
  func.func @transform_0(%arg0: i32) -> (i32, i32, i32) {
    %c0_i32 = arith.constant 0 : i32
    %c0_i32_0 = arith.constant 0 : i32
    %c0_i32_1 = arith.constant 0 : i32
    return %arg0, %c0_i32, %c0_i32_0 : i32, i32, i32
  }
  func.func @transform_1(%arg0: i32) -> (i32, i32) {
    %c0_i32 = arith.constant 0 : i32
    %c0_i32_0 = arith.constant 0 : i32
    %c0_i32_1 = arith.constant 0 : i32
    return %c0_i32, %c0_i32_0 : i32, i32
  }
  func.func @transform_2(%arg0: i32) -> (i32, i32) {
    %c0_i32 = arith.constant 0 : i32
    %c0_i32_0 = arith.constant 0 : i32
    %c0_i32_1 = arith.constant 0 : i32
    return %c0_i32, %c0_i32_0 : i32, i32
  }
  func.func @transform_3(%arg0: i32) -> (i32, i32, i32) {
    %c0_i32 = arith.constant 0 : i32
    %c0_i32_0 = arith.constant 0 : i32
    %c0_i32_1 = arith.constant 0 : i32
    return %arg0, %c0_i32, %c0_i32_0 : i32, i32, i32
  }
}

</mosaic_0001>

<bundles_post_ra>
// kernel: wavenet_layer_init.1
= control target key start
LH: loop header
LB: loop body
LE: loop exit
PB: predicated region body
PF: predicated region fallthrough
CT: control target
= control target key end

     0   :  { %8 = vsyncpa [#allocation4], 0  ;;  %s633_s0 = inlined_call_operand.vmem [shape: f32[2,8,128], index: 0, kind: input, shape index: {}]   ;;  %s634_s1 = inlined_call_operand.vmem [shape: f32[8,24], index: 1, kind: input, shape index: {}]   ;;  %s635_s2 = inlined_call_operand.vmem [shape: f32[8,1], index: 2, kind: input, shape index: {}]   ;;  %s636_s3 = inlined_call_operand.hbm [shape: f32[2,8,128], index: 3, kind: output, shape index: {}]  }
   0x1   :  { %10 = vsyncpa [#allocation4 + $0x1], 0  ;;  %s527_s12 = smov 0   ;;  %s529_s13 = smov 0  }
   0x2   :  { %s531_s14 = smov 0   ;;  %s533_s15 = smov 0  }
   0x3 LB: > { %s548_s16 = sadd.s32 4294967295, %s497_s15   ;;  %s349_s17 = sadd.s32 4294967294, %s497_s15   ;;  %s497_s15 = sphi %s533_s15, %s642_s15   ;;  %s493_s14 = sphi %s531_s14, %s641_s14   ;;  %s489_s13 = sphi %s529_s13, %s640_s13   ;;  %s485_s12 = sphi %s527_s12, %s639_s12  }
   0x4   : > { %s552_s18 = sadd.s32 1, %s497_s15   ;;  %s91_s19 = sadd.s32 1, %s493_s14 }
   0x5   : > { %s88_s20 = ssub.s32 %s497_s15, %s552_s18  ;;  %p101_p0 = scmp.ne.s32.totalorder %s493_s14, %s489_s13 }
   0x6   : > { %p89_p1 = scmp.eq.s32.totalorder %s88_s20, 0  ;;  %p102_p2 = scmp.eq.s32.totalorder %s548_s16, 1 }
   0x7   : > { %p107_p3 = scmp.ne.s32.totalorder %s489_s13, %s485_s12  ;;  %p108_p4 = scmp.eq.s32.totalorder %s349_s17, 1 }
   0x8   : > { %s563_s21 = scalar_select %p89_p1, %s493_s14, %s91_s19  }
   0x9   : > { %p565_p5 = por %p102_p2, %p101_p0  ;;  %p569_p6 = por %p108_p4, %p107_p3 }
   0xa   : > { %p352_p7 = scmp.ge.s32.totalorder %s497_s15, 1  ;;  %p139_p8 = scmp.lt.s32.totalorder %s497_s15, 3 }
   0xc   : > { %p140_p9 = pnand %p352_p7, %p139_p8 }
   0xd   : > { %p162_p10 = scmp.lt.s32.totalorder (!%p140_p9), %s548_s16, 1  ;;  %v499_v0 = vmov (!%p140_p9), 0.0|0.0   ;;  %v184_v1 = vld [vmem:[%s635_s2] sm:$0xff] (!%p140_p9)  ;;  %vm500_vm0 = vmmov (!%p140_p9), 0   ;;  %v501_v2 = vmov (!%p140_p9), 0.0   ;;  %v502_v3 = vmov (!%p140_p9), 0  }
   0xe   : > { %143 = sbr.rel (%p140_p9) target bundleno = 412 (0x19c), region = 32  ;;  %377 = vmatprep.subr.bf16.mxu0 (!%p140_p9), %v499_v0  ;;  %374 = vmatprep.mubr.msk.f32.mxu0 (!%p140_p9), %vm500_vm0, %v501_v2  ;;  %s503_s4 = smov (!%p140_p9), 1   ;;  %v166_v5 = vlaneseq (!%p140_p9)  ;;  %vm505_vm2 = vmmov (!%p140_p9), 1   ;;  %v180_v10 = vld [vmem:[%s634_s1] sm:$0xff] (!%p140_p9)  ;;  %vm190_vm5 = vcmask (!%p140_p9), 195584  }
   0xf   : > { %429 = vset.pattern.permute.xlu1 (!%p140_p9), %v502_v3  ;;  %430 = vset.pattern.permute.xlu0 (!%p140_p9), %v502_v3  ;;  %s504_s5 = smov (!%p140_p9), 127   ;;  %s159_s8 = sand.u32 (!%p140_p9), 1, %s489_s13  }
  0x10   : > { %187 = vperm.xlu1 (!%p140_p9), %429, %v184_v1   ;;  %v167_v6 = vand.u32 (!%p140_p9), 127, %v166_v5  ;;  %s353_s9 = sshll.u32 (!%p140_p9), %s159_s8, 3  ;;  %s357_s10 = sshll.u32 (!%p140_p9), %s548_s16, 7 }
  0x11   : > { %s161_s11 = scalar_lea.vmem (!%p140_p9), [#allocation3], %s353_s9  ;;  %s591_s24 = scalar_lea.hbm (!%p140_p9), %s636_s3, %s357_s10 }
  0x12   : > { %vm381_vm1 = vcmp.ne.s32.totalorder (!%p140_p9), %v167_v6, 0  ;;  %vm382_vm4 = vcmp.ne.s32.totalorder (!%p140_p9), %v167_v6, 127  ;;  %s290_s17 = sshll.u32 (!%p140_p9), %s161_s11, 4  ;;  %s277_s25 = scalar_lea.sflag (!%p140_p9), [#allocation4], %s159_s8  ;;  %s593_s17 = int_to_ptr.vmem [resolvable:$true] %s290_s17 }
  0x13   : > { %vm379_vm3 = vmpackc.low (!%p140_p9), %vm505_vm2, %vm381_vm1 }
  0x15   : > { %s163_s26 = scalar_select %p162_p10, %s548_s16, 1 }
  0x16   : > { %s506_s16 = smov [#allocation3]  }
  0x17   : > { %s354_s27 = sshll.u32 %s163_s26, 3  ;;  %s435_s26 = scalar_lea.vmem %s593_s17, 128 }
  0x18   : > { %s165_s30 = scalar_lea.vmem %s633_s0, %s354_s27  ;;  %p436_p11 = scmp.ne.s32.totalorder %s593_s17, %s435_s26 }
  0x19   : > { %v170_v4 = vld [vmem:[%s165_s30] sm:$0xff]  ;;  %s439_s27 = sshll.u32 %s506_s16, 4  ;;  %s440_s27 = int_to_ptr.vmem [resolvable:$false] %s439_s27 }
  0x1a   : > { %171 = vrot.lane.b32.xlu0 %v170_v4, %s503_s4  ;;  %p437_p12 = pnand %p436_p11, %p565_p5  ;;  %s441_s28 = scalar_lea.vmem %s440_s27, 256 }
  0x1b   : > { %p442_p0 = scmp.lt.s32.totalorder %s593_s17, %s440_s27  ;;  %p443_p1 = scmp.lt.s32.totalorder %s441_s28, %s435_s26 }
  0x1c   : > { %p438_p13 = pneg %p437_p12 }
  0x1d   : > { %p444_p2 = por %p443_p1, %p442_p0 }
  0x1e   : > { %174 = vrot.lane.b32.xlu0 %v170_v4, %s504_s5 }
  0x1f   : > { %p445_p3 = pnand %p444_p2, %p438_p13 }
  0x8c   : > { %v172_v7 = vpop.permute.xlu0 %171 }
  0x8d   : > { %v378_v8 = vpack.c.bf16 %v170_v4, %v172_v7 }
  0x8f   : > { %380 = vmatpush3.bf16.msk.msra.mxu0 %vm379_vm3, %v378_v8  ;;  %v188_v11 = vpop.permute.xlu1 %187 }
  0x90   : > { %372 = vmatprep.subr.mxu0 %v501_v2  ;;  %v175_v9 = vpop.permute.xlu0 %174 }
  0x93   : > { %373 = vmatpush3.msk.msra.mxu0 %vm382_vm4, %v175_v9 }
  0x94   : > { %375 = vmatmul.mubr.msk.f32.vlgmr.msra.gmra.mrb[0].mxu0 %vm190_vm5, %v180_v10 }
 0x167   : > { %v260_v12 = vpop.f32.mrb[0].mxu0 }
 0x168   : > { %v261_v13 = vadd.f32 %v260_v12, %v188_v11  ;;  %v376_v14 = vpop.f32.mrb[1].mxu0 }
 0x16a   : > { %v264_v15 = vmax.f32 %v261_v13, -30.0 }
 0x16c   : > { %v265_v16 = vsub.f32 0.0, %v264_v15 }
 0x16e   : > { %v266_v17 = vmul.f32 1.442695, %v265_v16 }
 0x170   : > { %431 = vpow2.f32 %v266_v17 }
 0x17a   : > { %v432_v18 = vpop.eup %431 }
 0x17b   : > { %v269_v19 = vmul.f32 %v432_v18, %v432_v18  ;;  %v268_v21 = vsub.f32 1.0, %v432_v18 }
 0x17d   : > { %v270_v20 = vadd.f32 1.0, %v269_v19 }
 0x17f   : > { %433 = vrcp.f32 %v270_v20 }
 0x189   : > { %v434_v22 = vpop.eup %433 }
 0x18a   : > { %v272_v23 = vmul.f32 %v434_v22, %v268_v21 }
 0x18c   : > { %v274_v24 = vadd.f32 %v272_v23, %v170_v4 }
 0x18e   : > { %275 = vst [vmem:[%s161_s11] sm:$0xff] %v274_v24 }
 0x18f   : > { %448 = shalt.err (!%p445_p3)
}
 0x190   : > { %s449_s29 = scalar_lea.hbm %s591_s24, 128  ;;  %s453_s5 = scalar_lea.hbm %s636_s3, 256 }
 0x191   : > { %p450_p4 = scmp.ne.s32.totalorder %s591_s24, %s449_s29  ;;  %p454_p9 = scmp.lt.u32.totalorder %s591_s24, %s636_s3 }
 0x192   : > { %p455_p10 = scmp.lt.u32.totalorder %s453_s5, %s449_s29  ;;  %p457_p12 = scmp.lt.u32.totalorder %s449_s29, %s591_s24 }
 0x193   : > { %p451_p7 = pnand %p450_p4, %p565_p5 }
 0x194   : > { %p456_p11 = por %p455_p10, %p454_p9 }
 0x195   : > { %p452_p8 = pneg %p451_p7 }
 0x196   : > { %p458_p13 = por %p457_p12, %p456_p11 }
 0x198   : > { %p459_p0 = pnand %p458_p13, %p452_p8 }
 0x19a   : > { %462 = shalt.err (!%p459_p0)
}
 0x19b   : > { %383 = dma.vmem_to_hbm [thread:$0]  (%p565_p5), %s593_s17, 128, %s591_s24, %s277_s25  }
 0x19c PF: > { %p389_p1 = scmp.ge.s32.totalorder %s497_s15, 2  ;;  %s302_s8 = sand.u32 1, %s485_s12  }
 0x19d   : > { %s303_s9 = scalar_lea.sflag [#allocation4], %s302_s8 }
 0x19e   : > { %p386_p2 = pnand %p389_p1, %p569_p6 }
 0x1a0   : > { %480 = dma.done.wait (!%p386_p2), %s303_s9, 128  }
 0x1a1   : > { %482 = vsyncadd (!%p386_p2), %s303_s9, 4294967168  ;;  %p13_p3 = scmp.ge.s32.totalorder %s552_s18, 4   ;;  %s639_s12 = smov %s489_s13 }
 0x1a2   : > { %s640_s13 = smov %s493_s14  ;;  %s641_s14 = smov %s563_s21 }
 0x1a3   : > { %s642_s15 = smov %s552_s18  ;;  %15 = sbr.rel (!%p13_p3) target bundleno = 3 (0x3), region = 67 }
 0x1aa   :  { %308 = vsyncpa [#allocation4], 1 }
 0x1ab   :  { %310 = vsyncpa [#allocation4 + $0x1], 1 }

</bundles_post_ra>
